<compile_context>
chip_gen: v7x
topology: tpu7x:2x2x1
jax: 0.10.0
libtpu: 0.0.40
codegen_flags: <defaults>
</compile_context>

<pallas_src>
import math

import jax
import jax.numpy as jnp
from jax.experimental import pallas as pl
from jax.experimental.pallas import tpu as pltpu

_LANE = 128          # lane width (last-dim tiling unit)
_BF16_SUBLANE = 16   # bf16 packed sublane tile; row tiles rounded to this


def _round_up(v, m):
    return ((v + m - 1) // m) * m


def _cdiv(a, b):
    return -(-a // b)


def make_mlp_kernel(n_linear):
    """Fused kernel; refs = (x, w0, b0, w1, b1, ..., out)."""

    def kernel(*refs):
        x_ref = refs[0]
        o_ref = refs[-1]
        h = x_ref[...]                          # bf16 activations feed the MXU
        for i in range(n_linear):
            w = refs[1 + 2 * i][...]            # bf16 (in, out_pad), VMEM-resident
            b = refs[2 + 2 * i][...]            # f32  (1, out_pad)
            # bf16 x bf16 -> f32 accumulate on the MXU; bias add in f32 on the VPU.
            acc = jnp.dot(h, w, preferred_element_type=jnp.float32) + b
            if i < n_linear - 1:                # ReLU on all but the last layer
                h = jnp.maximum(acc, 0.0).astype(jnp.bfloat16)
            else:
                o_ref[...] = acc.astype(o_ref.dtype)   # bf16, lane-dense store

    return kernel


def _choose_row_tiling(n_rows, tile_n):
    """Pick the number of row tiles first, then the tile size (minimal batch padding)."""
    tile_n = max(_BF16_SUBLANE, _round_up(tile_n, _BF16_SUBLANE))
    g = max(1, _cdiv(n_rows, tile_n))                    # number of tiles first ...
    tile = _round_up(_cdiv(n_rows, g), _BF16_SUBLANE)    # ... then the per-tile rows
    # v7x megacore: a single grid step leaves the second TensorCore idle -> split.
    if g == 1 and tile > _BF16_SUBLANE:
        tile = max(_BF16_SUBLANE, _round_up(_cdiv(tile, 2), _BF16_SUBLANE))
    g = _cdiv(n_rows, tile)
    return tile, g, g * tile


def mlp_pallas(x, weights_t, biases, *, tile_n=2048):
    """Run the whole MLP in a single batch-tiled pallas_call.

    x:         (N, input_dim) float32
    weights_t: list of (in_dim, out_dim) arrays (already transposed from PyTorch layout)
    biases:    list of (1, out_dim) arrays
    Returns:   (N, output_dim) float32
    """
    assert len(weights_t) == len(biases)
    n_linear = len(weights_t)
    n_rows, in_dim = x.shape
    out_dim = weights_t[-1].shape[1]

    # Feature dims at every layer boundary.  Input stays UNPADDED (avoids inflating the
    # x stream when in_dim << 128); hidden/output dims are padded to 128 lanes so all
    # matmul outputs and the final store are lane-dense.  Zero padding is exact: padded
    # weight rows/cols and zero biases contribute 0 to the f32 accumulator and padded
    # output columns are sliced away below.
    dims = [in_dim] + [w.shape[1] for w in weights_t]
    dims_p = [in_dim] + [_round_up(d, _LANE) for d in dims[1:]]
    out_pad = dims_p[-1]

    tile, grid_n, n_pad = _choose_row_tiling(n_rows, tile_n)

    # Row-pad & cast x once in the wrapper (bf16).
    x_p = jnp.zeros((n_pad, in_dim), jnp.bfloat16)
    x_p = x_p.at[:n_rows, :].set(x.astype(jnp.bfloat16))

    w_p, b_p = [], []
    for i, (w, b) in enumerate(zip(weights_t, biases)):
        wp = jnp.zeros((dims_p[i], dims_p[i + 1]), jnp.bfloat16)
        wp = wp.at[: w.shape[0], : w.shape[1]].set(w.astype(jnp.bfloat16))
        bp = jnp.zeros((1, dims_p[i + 1]), jnp.float32)
        bp = bp.at[:, : b.shape[1]].set(b.astype(jnp.float32))
        w_p.append(wp)
        b_p.append(bp)

    operands = [x_p]
    in_specs = [pl.BlockSpec((tile, in_dim), lambda i: (i, 0))]
    for wp, bp in zip(w_p, b_p):
        operands += [wp, bp]
        # Constant block index -> weights/biases stay VMEM-resident, DMA'd once.
        in_specs += [
            pl.BlockSpec(wp.shape, lambda i: (0, 0)),
            pl.BlockSpec(bp.shape, lambda i: (0, 0)),
        ]
    out_spec = pl.BlockSpec((tile, out_pad), lambda i: (i, 0))

    # Advisory cost estimate (padded problem, bf16 in / bf16 out).
    flops = 2 * n_pad * sum(dims_p[i] * dims_p[i + 1] for i in range(n_linear))
    bytes_accessed = (
        x_p.size * 2
        + n_pad * out_pad * 2
        + sum(w.size * 2 for w in w_p)
        + sum(b.size * 4 for b in b_p)
    )

    # VMEM budget: resident weights/biases + double-buffered x/out tiles + live
    # intermediate activations (bf16 h + f32 acc, ~2 layers live) + headroom for
    # Mosaic internal scratch; clamped to [32 MiB default, 48 MiB] so it stays safely
    # under v7x's 64 MiB physical VMEM while still covering the large-tile case.
    resident = sum(w.size * 2 for w in w_p) + sum(b.size * 4 for b in b_p)
    io_tiles = 2 * (tile * in_dim * 2 + tile * out_pad * 2)
    max_feat = max(dims_p)
    act_tiles = 2 * tile * max_feat * (2 + 4)
    vmem_limit = int(min(max(resident + io_tiles + act_tiles + (8 << 20), 32 << 20), 48 << 20))
    # TODO(synk): if resident weight bytes grow past ~40 MiB (wide hidden_dim / many
    # layers), stream weights over a second grid axis instead of keeping them resident.
    # TODO(synk): for tiny out_dim an unpadded (tile, out_dim) output block cuts writeback
    # traffic further (at the cost of masked vst); benchmark against this padded-bf16 path.

    out_p = pl.pallas_call(
        make_mlp_kernel(n_linear),
        out_shape=jax.ShapeDtypeStruct((n_pad, out_pad), jnp.bfloat16),
        grid=(grid_n,),
        in_specs=in_specs,
        out_specs=out_spec,
        compiler_params=pltpu.CompilerParams(
            dimension_semantics=("parallel",),   # shards rows across v7x's 2 TCs
            vmem_limit_bytes=vmem_limit,
        ),
        cost_estimate=pl.CostEstimate(
            flops=flops, transcendentals=0, bytes_accessed=bytes_accessed
        ),
    )(*operands)

    return out_p[:n_rows, :out_dim].astype(jnp.float32)


def init_mlp_params(key, input_dim, output_dim, num_layers, hidden_dim):
    """Deterministic init mimicking PyTorch nn.Linear default (U(-1/sqrt(in), 1/sqrt(in)))."""
    dims = [input_dim, hidden_dim]
    for _ in range(num_layers):
        dims.append(hidden_dim)
    dims.append(output_dim)

    weights_t, biases = [], []
    for i in range(len(dims) - 1):
        d_in, d_out = dims[i], dims[i + 1]
        key, kw, kb = jax.random.split(key, 3)
        bound = 1.0 / math.sqrt(d_in)
        # PyTorch stores weight as (out, in); we keep it transposed as (in, out).
        w_t = jax.random.uniform(kw, (d_in, d_out), jnp.float32, -bound, bound)
        b = jax.random.uniform(kb, (1, d_out), jnp.float32, -bound, bound)
        weights_t.append(w_t)
        biases.append(b)
    return weights_t, biases


def mlp_reference_f32(x, weights_t, biases):
    """Plain-JAX f32 reference of the module's forward pass."""
    h = x
    n = len(weights_t)
    for i, (w, b) in enumerate(zip(weights_t, biases)):
        h = h @ w + b
        if i < n - 1:
            h = jnp.maximum(h, 0.0)
    return h


def mlp_reference_bf16(x, weights_t, biases):
    """Plain-JAX reference with the same bf16-operand / f32-accumulate / bf16-output numerics."""
    h = x.astype(jnp.bfloat16)
    n = len(weights_t)
    out = None
    for i, (w, b) in enumerate(zip(weights_t, biases)):
        acc = jnp.dot(h, w.astype(jnp.bfloat16),
                      preferred_element_type=jnp.float32) + b.astype(jnp.float32)
        if i < n - 1:
            h = jnp.maximum(acc, 0.0).astype(jnp.bfloat16)
        else:
            out = acc.astype(jnp.bfloat16).astype(jnp.float32)
    return out


if __name__ == "__main__":
    # Small shapes consistent with the module: MLP(input_dim=4, output_dim=3,
    # num_layers=1, hidden_dim=32) applied to a batch of 8 points.
    input_dim, output_dim, num_layers, hidden_dim = 4, 3, 1, 32
    batch = 8

    key = jax.random.PRNGKey(0)
    key, kx = jax.random.split(key)
    x = jax.random.normal(kx, (batch, input_dim), jnp.float32)

    weights_t, biases = init_mlp_params(key, input_dim, output_dim, num_layers, hidden_dim)

    out = jax.block_until_ready(mlp_pallas(x, weights_t, biases))
    assert out.shape == (batch, output_dim)

    ref_bf16 = mlp_reference_bf16(x, weights_t, biases)
    ref_f32 = mlp_reference_f32(x, weights_t, biases)
    # Tolerances account for the bf16 rounding of the stored output (1 ulp ~ 0.8% rel).
    assert jnp.allclose(out, ref_bf16, atol=2e-2, rtol=2e-2), "mismatch vs bf16 reference"
    assert jnp.allclose(out, ref_f32, atol=6e-2, rtol=6e-2), "mismatch vs f32 reference"

    # Secondary check exercising the multi-tile grid path (minimal row padding: 600 -> 608).
    key, kx2 = jax.random.split(key)
    x2 = jax.random.normal(kx2, (600, input_dim), jnp.float32)
    out2 = jax.block_until_ready(mlp_pallas(x2, weights_t, biases))
    ref2 = mlp_reference_bf16(x2, weights_t, biases)
    assert out2.shape == (600, output_dim)
    assert jnp.allclose(out2, ref2, atol=2e-2, rtol=2e-2), "tiled path mismatch"

    print("KERNEL_OK")
</pallas_src>

<mosaic_0001>
module attributes {stable_mosaic.version = 11 : i64} {
  func.func @kernel(%arg0: i32, %arg1: memref<16x4xbf16, #tpu.memory_space<vmem>>, %arg2: memref<4x128xbf16, #tpu.memory_space<vmem>>, %arg3: memref<1x128xf32, #tpu.memory_space<vmem>>, %arg4: memref<128x128xbf16, #tpu.memory_space<vmem>>, %arg5: memref<1x128xf32, #tpu.memory_space<vmem>>, %arg6: memref<128x128xbf16, #tpu.memory_space<vmem>>, %arg7: memref<1x128xf32, #tpu.memory_space<vmem>>, %arg8: memref<16x128xbf16, #tpu.memory_space<vmem>>) attributes {dimension_semantics = [#tpu.dimension_semantics<parallel>], iteration_bounds = array<i64: 1>, scalar_prefetch = 0 : i64, scratch_operands = 0 : i64, tpu.core_type = #tpu.core_type<tc>, window_params = [{transform_indices = @transform_0, window_bounds = array<i64: 16, 4>}, {pipeline_mode = #tpu.pipeline_mode<synchronous>, transform_indices = @transform_1, window_bounds = array<i64: 4, 128>}, {pipeline_mode = #tpu.pipeline_mode<synchronous>, transform_indices = @transform_2, window_bounds = array<i64: 1, 128>}, {pipeline_mode = #tpu.pipeline_mode<synchronous>, transform_indices = @transform_3, window_bounds = array<i64: 128, 128>}, {pipeline_mode = #tpu.pipeline_mode<synchronous>, transform_indices = @transform_4, window_bounds = array<i64: 1, 128>}, {pipeline_mode = #tpu.pipeline_mode<synchronous>, transform_indices = @transform_5, window_bounds = array<i64: 128, 128>}, {pipeline_mode = #tpu.pipeline_mode<synchronous>, transform_indices = @transform_6, window_bounds = array<i64: 1, 128>}, {transform_indices = @transform_7, window_bounds = array<i64: 16, 128>}]} {
    %c0 = arith.constant 0 : index
    %c0_0 = arith.constant 0 : index
    %0 = vector.load %arg1[%c0, %c0_0] : memref<16x4xbf16, #tpu.memory_space<vmem>>, vector<16x4xbf16>
    %c0_1 = arith.constant 0 : index
    %c0_2 = arith.constant 0 : index
    %1 = vector.load %arg2[%c0_1, %c0_2] : memref<4x128xbf16, #tpu.memory_space<vmem>>, vector<4x128xbf16>
    %c0_3 = arith.constant 0 : index
    %c0_4 = arith.constant 0 : index
    %2 = vector.load %arg3[%c0_3, %c0_4] : memref<1x128xf32, #tpu.memory_space<vmem>>, vector<1x128xf32>
    %cst = arith.constant dense<0.000000e+00> : vector<16x128xf32>
    %3 = tpu.matmul %0, %1, %cst {dimension_numbers = #tpu.dot_dimension_numbers<[1], [0], [0], [1], [0, 0, 1, 1], [], []>} : vector<16x4xbf16>, vector<4x128xbf16>, vector<16x128xf32> -> vector<16x128xf32>
    %4 = vector.broadcast %2 : vector<1x128xf32> to vector<16x128xf32>
    %5 = arith.addf %3, %4 : vector<16x128xf32>
    %cst_5 = arith.constant 0.000000e+00 : f32
    %6 = vector.broadcast %cst_5 : f32 to vector<16x128xf32>
    %7 = arith.maximumf %5, %6 : vector<16x128xf32>
    %8 = arith.truncf %7 : vector<16x128xf32> to vector<16x128xbf16>
    %c0_6 = arith.constant 0 : index
    %c0_7 = arith.constant 0 : index
    %9 = vector.load %arg4[%c0_6, %c0_7] : memref<128x128xbf16, #tpu.memory_space<vmem>>, vector<128x128xbf16>
    %c0_8 = arith.constant 0 : index
    %c0_9 = arith.constant 0 : index
    %10 = vector.load %arg5[%c0_8, %c0_9] : memref<1x128xf32, #tpu.memory_space<vmem>>, vector<1x128xf32>
    %cst_10 = arith.constant dense<0.000000e+00> : vector<16x128xf32>
    %11 = tpu.matmul %8, %9, %cst_10 {dimension_numbers = #tpu.dot_dimension_numbers<[1], [0], [0], [1], [0, 0, 1, 1], [], []>} : vector<16x128xbf16>, vector<128x128xbf16>, vector<16x128xf32> -> vector<16x128xf32>
    %12 = vector.broadcast %10 : vector<1x128xf32> to vector<16x128xf32>
    %13 = arith.addf %11, %12 : vector<16x128xf32>
    %cst_11 = arith.constant 0.000000e+00 : f32
    %14 = vector.broadcast %cst_11 : f32 to vector<16x128xf32>
    %15 = arith.maximumf %13, %14 : vector<16x128xf32>
    %16 = arith.truncf %15 : vector<16x128xf32> to vector<16x128xbf16>
    %c0_12 = arith.constant 0 : index
    %c0_13 = arith.constant 0 : index
    %17 = vector.load %arg6[%c0_12, %c0_13] : memref<128x128xbf16, #tpu.memory_space<vmem>>, vector<128x128xbf16>
    %c0_14 = arith.constant 0 : index
    %c0_15 = arith.constant 0 : index
    %18 = vector.load %arg7[%c0_14, %c0_15] : memref<1x128xf32, #tpu.memory_space<vmem>>, vector<1x128xf32>
    %cst_16 = arith.constant dense<0.000000e+00> : vector<16x128xf32>
    %19 = tpu.matmul %16, %17, %cst_16 {dimension_numbers = #tpu.dot_dimension_numbers<[1], [0], [0], [1], [0, 0, 1, 1], [], []>} : vector<16x128xbf16>, vector<128x128xbf16>, vector<16x128xf32> -> vector<16x128xf32>
    %20 = vector.broadcast %18 : vector<1x128xf32> to vector<16x128xf32>
    %21 = arith.addf %19, %20 : vector<16x128xf32>
    %22 = arith.truncf %21 : vector<16x128xf32> to vector<16x128xbf16>
    %c0_17 = arith.constant 0 : index
    %c0_18 = arith.constant 0 : index
    %23 = vector.load %arg8[%c0_17, %c0_18] : memref<16x128xbf16, #tpu.memory_space<vmem>>, vector<16x128xbf16>
    tpu.vector_store %arg8[%c0_17, %c0_18], %22 {strides = array<i32>} : memref<16x128xbf16, #tpu.memory_space<vmem>>, vector<16x128xbf16>,
    return
  }
  func.func @transform_0(%arg0: i32) -> (i32, i32) {
    %c0_i32 = arith.constant 0 : i32
    %c0_i32_0 = arith.constant 0 : i32
    return %arg0, %c0_i32 : i32, i32
  }
  func.func @transform_1(%arg0: i32) -> (i32, i32) {
    %c0_i32 = arith.constant 0 : i32
    %c0_i32_0 = arith.constant 0 : i32
    %c0_i32_1 = arith.constant 0 : i32
    return %c0_i32, %c0_i32_0 : i32, i32
  }
  func.func @transform_2(%arg0: i32) -> (i32, i32) {
    %c0_i32 = arith.constant 0 : i32
    %c0_i32_0 = arith.constant 0 : i32
    %c0_i32_1 = arith.constant 0 : i32
    return %c0_i32, %c0_i32_0 : i32, i32
  }
  func.func @transform_3(%arg0: i32) -> (i32, i32) {
    %c0_i32 = arith.constant 0 : i32
    %c0_i32_0 = arith.constant 0 : i32
    %c0_i32_1 = arith.constant 0 : i32
    return %c0_i32, %c0_i32_0 : i32, i32
  }
  func.func @transform_4(%arg0: i32) -> (i32, i32) {
    %c0_i32 = arith.constant 0 : i32
    %c0_i32_0 = arith.constant 0 : i32
    %c0_i32_1 = arith.constant 0 : i32
    return %c0_i32, %c0_i32_0 : i32, i32
  }
  func.func @transform_5(%arg0: i32) -> (i32, i32) {
    %c0_i32 = arith.constant 0 : i32
    %c0_i32_0 = arith.constant 0 : i32
    %c0_i32_1 = arith.constant 0 : i32
    return %c0_i32, %c0_i32_0 : i32, i32
  }
  func.func @transform_6(%arg0: i32) -> (i32, i32) {
    %c0_i32 = arith.constant 0 : i32
    %c0_i32_0 = arith.constant 0 : i32
    %c0_i32_1 = arith.constant 0 : i32
    return %c0_i32, %c0_i32_0 : i32, i32
  }
  func.func @transform_7(%arg0: i32) -> (i32, i32) {
    %c0_i32 = arith.constant 0 : i32
    %c0_i32_0 = arith.constant 0 : i32
    return %arg0, %c0_i32 : i32, i32
  }
}

</mosaic_0001>

<bundles_post_ra>
// kernel: tpu_custom_call.1
= control target key start
LH: loop header
LB: loop body
LE: loop exit
PB: predicated region body
PF: predicated region fallthrough
CT: control target
= control target key end

     0   :  { %12 = vsyncpa [#allocation3], 0  ;;  %s700_s0 = inlined_call_operand.vmem [shape: bf16[16,4], index: 0, kind: input, shape index: {}]   ;;  %s701_s1 = inlined_call_operand.vmem [shape: bf16[4,128], index: 1, kind: input, shape index: {}]   ;;  %s702_s2 = inlined_call_operand.vmem [shape: f32[1,128], index: 2, kind: input, shape index: {}]   ;;  %s703_s3 = inlined_call_operand.hbm [shape: bf16[128,128], index: 3, kind: input, shape index: {}]   ;;  %s704_s4 = inlined_call_operand.vmem [shape: f32[1,128], index: 4, kind: input, shape index: {}]   ;;  %s705_s5 = inlined_call_operand.hbm [shape: bf16[128,128], index: 5, kind: input, shape index: {}]   ;;  %s706_s6 = inlined_call_operand.vmem [shape: f32[1,128], index: 6, kind: input, shape index: {}]   ;;  %s707_s7 = inlined_call_operand.hbm [shape: bf16[16,128], index: 7, kind: output, shape index: {}]  }
   0x1   :  { %13 = vsyncpa [#allocation6], 0 }
   0x2   :  { %14 = vsyncpa [#allocation4], 0  ;;  %s570_s24 = smov [#allocation2]   ;;  %s498_s28 = scalar_lea.hbm %s703_s3, 1024 }
   0x3   :  { %s26_s25 = sshll.u32 %s570_s24, 4  ;;  %p499_p0 = scmp.ne.s32.totalorder %s703_s3, %s498_s28  ;;  %s27_s25 = int_to_ptr.vmem [resolvable:$true] %s26_s25 }
   0x4   :  { %p502_p1 = scmp.lt.u32.totalorder %s498_s28, %s703_s3 }
   0x6   :  { %p504_p2 = pnand %p502_p1, %p499_p0 }
   0x8   :  { %507 = shalt.err (!%p504_p2)
}
   0x9   :  { %s508_s10 = scalar_lea.vmem %s27_s25, 1024  ;;  %p513_p4 = scmp.lt.s32.totalorder %s27_s25, %s27_s25 }
   0xa   :  { %p509_p3 = scmp.ne.s32.totalorder %s27_s25, %s508_s10  ;;  %p514_p5 = scmp.lt.s32.totalorder %s508_s10, %s508_s10 }
   0xc   :  { %p515_p6 = por %p514_p5, %p513_p4 }
   0xe   :  { %p516_p7 = pnand %p515_p6, %p509_p3 }
  0x10   :  { %519 = shalt.err (!%p516_p7)
}
  0x11   :  { %s571_s11 = smov 64   ;;  %s572_s12 = smov 4  }
  0x12   :  { %32 = dma.hbm_to_vmem [thread:$0]  %s703_s3, 1024, %s27_s25, [#allocation3], %s571_s11, %s571_s11, %s572_s12  }
  0x13   :  { %s573_s15 = smov [#allocation5]   ;;  %s520_s19 = scalar_lea.hbm %s705_s5, 1024 }
  0x14   :  { %s40_s16 = sshll.u32 %s573_s15, 4  ;;  %p521_p8 = scmp.ne.s32.totalorder %s705_s5, %s520_s19  ;;  %s41_s16 = int_to_ptr.vmem [resolvable:$true] %s40_s16 }
  0x15   :  { %p524_p9 = scmp.lt.u32.totalorder %s520_s19, %s705_s5 }
  0x17   :  { %p526_p10 = pnand %p524_p9, %p521_p8 }
  0x19   :  { %529 = shalt.err (!%p526_p10)
}
  0x1a   :  { %s530_s24 = scalar_lea.vmem %s41_s16, 1024  ;;  %p535_p12 = scmp.lt.s32.totalorder %s41_s16, %s41_s16 }
  0x1b   :  { %p531_p11 = scmp.ne.s32.totalorder %s41_s16, %s530_s24  ;;  %p536_p13 = scmp.lt.s32.totalorder %s530_s24, %s530_s24 }
  0x1d   :  { %p537_p0 = por %p536_p13, %p535_p12 }
  0x1f   :  { %p538_p1 = pnand %p537_p0, %p531_p11 }
  0x21   :  { %541 = shalt.err (!%p538_p1)
}
  0x22   :  { %46 = dma.hbm_to_vmem [thread:$0]  %s705_s5, 1024, %s41_s16, [#allocation6], %s571_s11, %s571_s11, %s572_s12  }
  0x23   :  { %564 = dma.done.wait [#allocation3], 1024  }
  0x24   :  { %565 = vsyncadd [#allocation3], 4294966272 }
  0x25   :  { %566 = dma.done.wait [#allocation6], 1024  }
  0x26   :  { %567 = vsyncadd [#allocation6], 4294966272  ;;  %v574_v0 = vmov 0.0   ;;  %vm575_vm0 = vmmov 0   ;;  %vm75_vm1 = vcmask 1041408   ;;  %v481_v3 = vld [vmem:[%s700_s0] sm:$0xff]  }
  0x27   :  { %428 = vmatprep.subr.bf16.mxu0 %v574_v0  ;;  %430 = vmatprep.mubr.msk.bf16.mxu0 %vm575_vm0, %v574_v0  ;;  %v58_v1 = vld [vmem:[%s701_s1] sm:$0x3]  ;;  %vm71_vm2 = vcmask 31744   ;;  %v483_v5 = vld [vmem:[#allocation2 + $0x8] sm:$0xff]   ;;  %v484_v6 = vld [vmem:[#allocation2 + $0x10] sm:$0xff]   ;;  %s576_s9 = smov [#allocation7]  }
  0x28   :  { %434 = vmatprep.subr.bf16.mxu1 %v574_v0  ;;  %450 = vmatprep.mubr.msk.bf16.mxu1 %vm575_vm0, %v574_v0  ;;  %v77_v2 = vsel %vm75_vm1, %v58_v1, 0  ;;  %v482_v4 = vld [vmem:[#allocation2] sm:$0xff]   ;;  %v485_v7 = vld [vmem:[#allocation2 + $0x18] sm:$0xff]   ;;  %v487_v9 = vld [vmem:[#allocation2 + $0x28] sm:$0xff]   ;;  %s365_s10 = sshll.u32 %s576_s9, 4  ;;  %s366_s10 = int_to_ptr.vmem [resolvable:$true] %s365_s10 }
  0x29   :  { %429 = vmatpush3.bf16.msra.mxu0 %v77_v2  ;;  %435 = vmatpush3.bf16.msra.mxu1 %v482_v4  ;;  %v486_v8 = vld [vmem:[#allocation2 + $0x20] sm:$0xff]   ;;  %v488_v10 = vld [vmem:[#allocation2 + $0x30] sm:$0xff]   ;;  %v489_v11 = vld [vmem:[#allocation2 + $0x38] sm:$0xff]   ;;  %p547_p3 = scmp.lt.s32.totalorder %s366_s10, %s366_s10 }
  0x2a   :  { %454 = vmatprep.subr.bf16.mxu0 %v574_v0  ;;  %436 = vmatprep.subr.bf16.mxu1 %v574_v0  ;;  %v490_v12 = vld [vmem:[#allocation5] sm:$0xff]   ;;  %v491_v13 = vld [vmem:[#allocation5 + $0x8] sm:$0xff]   ;;  %v492_v14 = vld [vmem:[#allocation5 + $0x10] sm:$0xff]  }
  0x2b   :  { %v493_v15 = vld [vmem:[#allocation5 + $0x18] sm:$0xff]   ;;  %v494_v16 = vld [vmem:[#allocation5 + $0x20] sm:$0xff]   ;;  %v495_v17 = vld [vmem:[#allocation5 + $0x28] sm:$0xff]  }
  0x2c   :  { %431 = vmatmul.mubr.msk.bf16.vlgmr.msra.gmra.mrb[0].mxu0 %vm71_vm2, %v481_v3  ;;  %v378_v18 = vld [vmem:[%s702_s2] ss:$0 sm:$0xff]  ;;  %v496_v28 = vld [vmem:[#allocation5 + $0x30] sm:$0xff]   ;;  %v497_v29 = vld [vmem:[#allocation5 + $0x38] sm:$0xff]  }
  0x2d   :  { %470 = vmatprep.mubr.msk.bf16.mxu0 %vm575_vm0, %v574_v0  ;;  %437 = vmatpush3.bf16.msra.mxu1 %v483_v5  ;;  %v381_v30 = vld [vmem:[%s704_s4] ss:$0 sm:$0xff]  ;;  %s542_s4 = scalar_lea.vmem %s366_s10, 128 }
  0x2e   :  { %438 = vmatprep.subr.bf16.mxu1 %v574_v0  ;;  %455 = vmatpush3.bf16.msra.mxu0 %v490_v12  ;;  %v390_v40 = vld [vmem:[%s706_s6] ss:$0 sm:$0xff]  ;;  %p543_p2 = scmp.ne.s32.totalorder %s366_s10, %s542_s4  ;;  %p548_p4 = scmp.lt.s32.totalorder %s542_s4, %s542_s4 }
  0x2f   :  { %456 = vmatprep.subr.bf16.mxu0 %v574_v0 }
  0x30   :  { %p549_p5 = por %p548_p4, %p547_p3 }
  0x31   :  { %439 = vmatpush3.bf16.msra.mxu1 %v484_v6 }
  0x32   :  { %440 = vmatprep.subr.bf16.mxu1 %v574_v0  ;;  %457 = vmatpush3.bf16.msra.mxu0 %v491_v13  ;;  %p550_p6 = pnand %p549_p5, %p543_p2 }
  0x33   :  { %458 = vmatprep.subr.bf16.mxu0 %v574_v0 }
  0x35   :  { %441 = vmatpush3.bf16.msra.mxu1 %v485_v7 }
  0x36   :  { %442 = vmatprep.subr.bf16.mxu1 %v574_v0  ;;  %459 = vmatpush3.bf16.msra.mxu0 %v492_v14 }
  0x37   :  { %460 = vmatprep.subr.bf16.mxu0 %v574_v0 }
  0x39   :  { %443 = vmatpush3.bf16.msra.mxu1 %v486_v8 }
  0x3a   :  { %444 = vmatprep.subr.bf16.mxu1 %v574_v0  ;;  %461 = vmatpush3.bf16.msra.mxu0 %v493_v15 }
  0x3b   :  { %462 = vmatprep.subr.bf16.mxu0 %v574_v0 }
  0x3d   :  { %445 = vmatpush3.bf16.msra.mxu1 %v487_v9 }
  0x3e   :  { %446 = vmatprep.subr.bf16.mxu1 %v574_v0  ;;  %463 = vmatpush3.bf16.msra.mxu0 %v494_v16 }
  0x3f   :  { %464 = vmatprep.subr.bf16.mxu0 %v574_v0 }
  0x41   :  { %447 = vmatpush3.bf16.msra.mxu1 %v488_v10 }
  0x42   :  { %448 = vmatprep.subr.bf16.mxu1 %v574_v0  ;;  %465 = vmatpush3.bf16.msra.mxu0 %v495_v17 }
  0x43   :  { %466 = vmatprep.subr.bf16.mxu0 %v574_v0 }
  0x45   :  { %449 = vmatpush3.bf16.msra.mxu1 %v489_v11 }
  0x46   :  { %467 = vmatpush3.bf16.msra.mxu0 %v496_v28 }
  0x47   :  { %468 = vmatprep.subr.bf16.mxu0 %v574_v0 }
  0x4a   :  { %469 = vmatpush3.bf16.msra.mxu0 %v497_v29 }
  0xff   :  { %v113_v19 = vpop.f32.mrb[0].mxu0 }
 0x100   :  { %v114_v20 = vadd.f32 %v378_v18, %v113_v19  ;;  %v432_v21 = vpop.f32.mrb[1].mxu0 }
 0x101   :  { %v116_v22 = vpop.f32.mrb[2].mxu0 }
 0x102   :  { %v117_v23 = vadd.f32 %v378_v18, %v116_v22  ;;  %v433_v24 = vpop.f32.mrb[3].mxu0  ;;  %v120_v25 = vmax.f32 %v114_v20, 0.0 }
 0x104   :  { %v121_v26 = vmax.f32 %v117_v23, 0.0 }
 0x106   :  { %v122_v27 = vpack.c.bf16 %v121_v26, %v120_v25 }
 0x108   :  { %451 = vmatmul.mubr.bf16.vlgmr.msra.gmra.mrb[0].mxu1 %v122_v27 }
 0x1db   :  { %v228_v31 = vpop.f32.mrb[0].mxu1 }
 0x1dc   :  { %v229_v32 = vadd.f32 %v381_v30, %v228_v31  ;;  %v452_v33 = vpop.f32.mrb[1].mxu1 }
 0x1dd   :  { %v231_v34 = vpop.f32.mrb[2].mxu1 }
 0x1de   :  { %v232_v35 = vadd.f32 %v381_v30, %v231_v34  ;;  %v453_v36 = vpop.f32.mrb[3].mxu1  ;;  %v235_v37 = vmax.f32 %v229_v32, 0.0 }
 0x1e0   :  { %v236_v38 = vmax.f32 %v232_v35, 0.0 }
 0x1e2   :  { %v237_v39 = vpack.c.bf16 %v236_v38, %v235_v37 }
 0x1e4   :  { %471 = vmatmul.mubr.bf16.vlgmr.msra.gmra.mrb[4].mxu0 %v237_v39 }
 0x2b7   :  { %v343_v41 = vpop.f32.mrb[4].mxu0 }
 0x2b8   :  { %v472_v42 = vpop.f32.mrb[5].mxu0  ;;  %v344_v44 = vadd.f32 %v390_v40, %v343_v41 }
 0x2b9   :  { %v346_v43 = vpop.f32.mrb[6].mxu0 }
 0x2ba   :  { %v347_v45 = vadd.f32 %v390_v40, %v346_v43  ;;  %v473_v46 = vpop.f32.mrb[7].mxu0 }
 0x2bc   :  { %v406_v47 = vpack.c.bf16 %v347_v45, %v344_v44 }
 0x2be   :  { %407 = vst [vmem:[#allocation7] sm:$0xff] %v406_v47  }
 0x2bf   :  { %553 = shalt.err (!%p550_p6)
}
 0x2c0   :  { %s554_s14 = scalar_lea.hbm %s707_s7, 128 }
 0x2c1   :  { %p555_p7 = scmp.ne.s32.totalorder %s707_s7, %s554_s14  ;;  %p558_p8 = scmp.lt.u32.totalorder %s554_s14, %s707_s7 }
 0x2c3   :  { %p560_p9 = pnand %p558_p8, %p555_p7 }
 0x2c5   :  { %563 = shalt.err (!%p560_p9)
}
 0x2c6   :  { %371 = dma.vmem_to_hbm [thread:$0]  %s366_s10, 128, %s707_s7, [#allocation4], %s571_s11, %s571_s11, %s572_s12  }
 0x2c7   :  { %568 = dma.done.wait [#allocation4], 128  }
 0x2c8   :  { %569 = vsyncadd [#allocation4], 4294967168 }
 0x2c9   :  { %375 = vsyncpa [#allocation3], 1 }
 0x2ca   :  { %376 = vsyncpa [#allocation6], 1 }
 0x2cb   :  { %377 = vsyncpa [#allocation4], 1 }

</bundles_post_ra>
